<compile_context>
chip_gen: v5e
topology: v5e:2x2
jax: 0.10.0
libtpu: 0.0.40
codegen_flags: <defaults>
</compile_context>

<pallas_src>
import functools

import jax
import jax.numpy as jnp
from jax.experimental import pallas as pl
from jax.experimental.pallas import tpu as pltpu


# ----------------------------------------------------------------------------
# Fused AttentionBlock kernel: one grid step == TN batch samples.
# ----------------------------------------------------------------------------
def _attention_block_kernel(x_ref, pred_ref, w1t_ref, b1_ref, w2t_ref, b2_ref,
                            out_ref, a_ref, *, C, S):
    # x_ref    : (TN, P, C*S)  samples x patches x (channel-major flat spatial)
    # pred_ref : (TN, P, 1)    per-patch scores
    # w1t_ref  : (P, Ph)       first 1x1-conv weight, transposed
    # b1_ref   : (1, Ph)
    # w2t_ref  : (Ph, P)       second 1x1-conv weight, transposed
    # b2_ref   : (1, P)
    # out_ref  : (TN, P, S)    mean_input * a
    # a_ref    : (TN, P, 1)    attention weights
    x = x_ref[...]

    # Channel mean: unrolled sum of C lane-aligned static slices (pure VALU).
    m = x[:, :, 0:S]
    for c in range(1, C):
        m = m + x[:, :, c * S:(c + 1) * S]
    m = m * (1.0 / C)

    # Stash the mean in the output tile and re-read it, so no separate
    # full-size intermediate has to stay live alongside x.
    out_ref[...] = m.astype(out_ref.dtype)
    m = out_ref[...]                                       # (TN, P, S)

    gap = jnp.mean(m, axis=-1)                             # AdaptiveAvgPool3d -> (TN, P)
    gmp = jnp.max(m, axis=-1)                              # AdaptiveMaxPool3d -> (TN, P)

    w1t = w1t_ref[...]                                     # (P, Ph)
    b1 = b1_ref[...]                                       # (1, Ph)
    w2t = w2t_ref[...]                                     # (Ph, P)
    b2 = b2_ref[...]                                       # (1, P)

    # One pass of the shared MLP over the stacked [gap; gmp] rows.
    tn = gap.shape[0]
    stacked = jnp.concatenate([gap, gmp], axis=0)          # (2*TN, P)
    h = jnp.maximum(
        jnp.dot(stacked, w1t, preferred_element_type=jnp.float32) + b1, 0.0)
    y = jnp.dot(h, w2t, preferred_element_type=jnp.float32) + b2   # (2*TN, P)

    pred = pred_ref[...][:, :, 0]                          # (TN, P)
    a = jax.nn.sigmoid(y[:tn] + y[tn:] + pred)             # attn1 + attn2 + pred

    out_ref[...] = (m * a[:, :, None]).astype(out_ref.dtype)
    a_ref[...] = a[:, :, None].astype(a_ref.dtype)


# ----------------------------------------------------------------------------
# Tile-size selection: ~2 MiB x tile (v7x-safe), >= 2 parallel programs,
# TN always divides N.
# ----------------------------------------------------------------------------
def _pick_tn(N, per_sample_bytes, target_bytes=2 << 20):
    tn = int(max(1, min(N, target_bytes // max(per_sample_bytes, 1))))
    if N >= 2:
        tn = min(tn, N // 2)           # keep >= 2 parallel programs (v7x megacore)
    tn = max(tn, 1)
    while N % tn:
        tn -= 1
    return tn


# ----------------------------------------------------------------------------
# Wrapper
# ----------------------------------------------------------------------------
def attention_block(x, patch_pred, params):
    """AttentionBlock.forward.

    x          : (N, P, C, D, H, W) float32   (torch layout: dim1=patch, dim2=channel)
    patch_pred : (N, P) float32
    returns (mean_input * a) of shape (N, P, D, H, W) and a of shape (N, P).
    """
    N, P, C, D, H, W = x.shape
    S = D * H * W
    CS = C * S
    Ph = params["w1"].shape[0]                              # = P // 2

    x3 = x.reshape(N, P, CS).astype(jnp.float32)            # free reshape (C,S contiguous)
    pred3 = patch_pred.reshape(N, P, 1).astype(jnp.float32)
    w1t = params["w1"].T.astype(jnp.float32)                # (P, Ph)
    b1r = params["b1"].reshape(1, Ph).astype(jnp.float32)
    w2t = params["w2"].T.astype(jnp.float32)                # (Ph, P)
    b2r = params["b2"].reshape(1, P).astype(jnp.float32)

    per_sample_bytes = P * CS * 4
    TN = _pick_tn(N, per_sample_bytes)
    grid = (N // TN,)

    # Explicit VMEM budget: double-buffered x + out tiles, plus slack for the
    # tiny weight/pred/a buffers.
    x_tile = TN * P * CS * 4
    out_tile = TN * P * S * 4
    vmem_limit = int(min(max(2 * (x_tile + out_tile) + (2 << 20), 16 << 20),
                         32 << 20))

    kern = functools.partial(_attention_block_kernel, C=C, S=S)

    out, a = pl.pallas_call(
        kern,
        out_shape=(jax.ShapeDtypeStruct((N, P, S), jnp.float32),
                   jax.ShapeDtypeStruct((N, P, 1), jnp.float32)),
        grid_spec=pltpu.PrefetchScalarGridSpec(
            num_scalar_prefetch=0,
            grid=grid,
            in_specs=[
                pl.BlockSpec((TN, P, CS), lambda n: (n, 0, 0)),
                pl.BlockSpec((TN, P, 1), lambda n: (n, 0, 0)),
                pl.BlockSpec((P, Ph), lambda n: (0, 0)),
                pl.BlockSpec((1, Ph), lambda n: (0, 0)),
                pl.BlockSpec((Ph, P), lambda n: (0, 0)),
                pl.BlockSpec((1, P), lambda n: (0, 0)),
            ],
            out_specs=(
                pl.BlockSpec((TN, P, S), lambda n: (n, 0, 0)),
                pl.BlockSpec((TN, P, 1), lambda n: (n, 0, 0)),
            ),
        ),
        compiler_params=pltpu.CompilerParams(
            dimension_semantics=("parallel",),
            vmem_limit_bytes=vmem_limit),
    )(x3, pred3, w1t, b1r, w2t, b2r)

    return out.reshape(N, P, D, H, W), a[..., 0]


# ----------------------------------------------------------------------------
# Deterministic synthetic parameters (PyTorch Conv3d(.,.,1) == matrix + bias)
# ----------------------------------------------------------------------------
def init_params(key, patch_num):
    k1, k2, k3, k4 = jax.random.split(key, 4)
    ph = patch_num // 2
    return dict(
        w1=jax.random.normal(k1, (ph, patch_num), jnp.float32) / jnp.sqrt(patch_num),
        b1=0.1 * jax.random.normal(k2, (ph,), jnp.float32),
        w2=jax.random.normal(k3, (patch_num, ph), jnp.float32) / jnp.sqrt(ph),
        b2=0.1 * jax.random.normal(k4, (patch_num,), jnp.float32),
    )


# ----------------------------------------------------------------------------
if __name__ == "__main__":
    N, P, C, D, H, W = 2, 8, 4, 8, 8, 8          # small demo shapes; S = 512 (lane-dense)

    key = jax.random.PRNGKey(0)
    kx, kp, kw = jax.random.split(key, 3)
    x = jax.random.normal(kx, (N, P, C, D, H, W), dtype=jnp.float32)
    patch_pred = jax.nn.sigmoid(jax.random.normal(kp, (N, P), dtype=jnp.float32))
    params = init_params(kw, P)

    fwd = jax.jit(attention_block)
    out, a = fwd(x, patch_pred, params)
    out, a = jax.block_until_ready((out, a))

    # ---- pure-JAX reference for correctness ----
    mean_input = x.mean(axis=2)                              # (N, P, D, H, W)
    gap = mean_input.mean(axis=(2, 3, 4))                    # (N, P)
    gmp = mean_input.max(axis=(2, 3, 4))                     # (N, P)

    def shared_mlp_ref(v):
        h = jnp.maximum(v @ params["w1"].T + params["b1"], 0.0)
        return h @ params["w2"].T + params["b2"]

    a_ref = jax.nn.sigmoid(shared_mlp_ref(gap) + shared_mlp_ref(gmp) + patch_pred)
    out_ref = mean_input * a_ref[:, :, None, None, None]

    assert out.shape == (N, P, D, H, W) and a.shape == (N, P)
    assert bool(jnp.all(jnp.isfinite(out))) and bool(jnp.all(jnp.isfinite(a)))
    assert bool(jnp.allclose(a, a_ref, atol=1e-5, rtol=1e-5))
    assert bool(jnp.allclose(out, out_ref, atol=1e-5, rtol=1e-5))
    print("KERNEL_OK")
</pallas_src>

<mosaic_0001>
module attributes {stable_mosaic.version = 11 : i64} {
  func.func @_attention_block_kernel(%arg0: i32, %arg1: memref<1x8x2048xf32, #tpu.memory_space<vmem>>, %arg2: memref<1x8x1xf32, #tpu.memory_space<vmem>>, %arg3: memref<8x4xf32, #tpu.memory_space<vmem>>, %arg4: memref<1x4xf32, #tpu.memory_space<vmem>>, %arg5: memref<4x8xf32, #tpu.memory_space<vmem>>, %arg6: memref<1x8xf32, #tpu.memory_space<vmem>>, %arg7: memref<1x8x512xf32, #tpu.memory_space<vmem>>, %arg8: memref<1x8x1xf32, #tpu.memory_space<vmem>>) attributes {dimension_semantics = [#tpu.dimension_semantics<parallel>], iteration_bounds = array<i64: 2>, scalar_prefetch = 0 : i64, scratch_operands = 0 : i64, tpu.core_type = #tpu.core_type<tc>, window_params = [{transform_indices = @transform_0, window_bounds = array<i64: 1, 8, 2048>}, {transform_indices = @transform_1, window_bounds = array<i64: 1, 8, 1>}, {pipeline_mode = #tpu.pipeline_mode<synchronous>, transform_indices = @transform_2, window_bounds = array<i64: 8, 4>}, {pipeline_mode = #tpu.pipeline_mode<synchronous>, transform_indices = @transform_3, window_bounds = array<i64: 1, 4>}, {pipeline_mode = #tpu.pipeline_mode<synchronous>, transform_indices = @transform_4, window_bounds = array<i64: 4, 8>}, {pipeline_mode = #tpu.pipeline_mode<synchronous>, transform_indices = @transform_5, window_bounds = array<i64: 1, 8>}, {transform_indices = @transform_6, window_bounds = array<i64: 1, 8, 512>}, {transform_indices = @transform_7, window_bounds = array<i64: 1, 8, 1>}]} {
    %c0 = arith.constant 0 : index
    %c0_0 = arith.constant 0 : index
    %c0_1 = arith.constant 0 : index
    %0 = vector.load %arg1[%c0, %c0_0, %c0_1] : memref<1x8x2048xf32, #tpu.memory_space<vmem>>, vector<1x8x2048xf32>
    %1 = vector.extract_strided_slice %0 {offsets = [0, 0, 0], sizes = [1, 8, 512], strides = [1, 1, 1]} : vector<1x8x2048xf32> to vector<1x8x512xf32>
    %2 = vector.extract_strided_slice %0 {offsets = [0, 0, 512], sizes = [1, 8, 512], strides = [1, 1, 1]} : vector<1x8x2048xf32> to vector<1x8x512xf32>
    %3 = arith.addf %1, %2 : vector<1x8x512xf32>
    %4 = vector.extract_strided_slice %0 {offsets = [0, 0, 1024], sizes = [1, 8, 512], strides = [1, 1, 1]} : vector<1x8x2048xf32> to vector<1x8x512xf32>
    %5 = arith.addf %3, %4 : vector<1x8x512xf32>
    %6 = vector.extract_strided_slice %0 {offsets = [0, 0, 1536], sizes = [1, 8, 512], strides = [1, 1, 1]} : vector<1x8x2048xf32> to vector<1x8x512xf32>
    %7 = arith.addf %5, %6 : vector<1x8x512xf32>
    %cst = arith.constant 2.500000e-01 : f32
    %8 = vector.broadcast %cst : f32 to vector<1x8x512xf32>
    %9 = arith.mulf %7, %8 : vector<1x8x512xf32>
    %c0_2 = arith.constant 0 : index
    %c0_3 = arith.constant 0 : index
    %c0_4 = arith.constant 0 : index
    %10 = vector.load %arg7[%c0_2, %c0_3, %c0_4] : memref<1x8x512xf32, #tpu.memory_space<vmem>>, vector<1x8x512xf32>
    tpu.vector_store %arg7[%c0_2, %c0_3, %c0_4], %9 {strides = array<i32>} : memref<1x8x512xf32, #tpu.memory_space<vmem>>, vector<1x8x512xf32>,
    %c0_5 = arith.constant 0 : index
    %c0_6 = arith.constant 0 : index
    %c0_7 = arith.constant 0 : index
    %11 = vector.load %arg7[%c0_5, %c0_6, %c0_7] : memref<1x8x512xf32, #tpu.memory_space<vmem>>, vector<1x8x512xf32>
    %cst_8 = arith.constant dense<0.000000e+00> : vector<1x8xf32>
    %12 = vector.multi_reduction <add>, %11, %cst_8 [2] : vector<1x8x512xf32> to vector<1x8xf32>
    %cst_9 = arith.constant 5.120000e+02 : f32
    %13 = vector.broadcast %cst_9 : f32 to vector<1x8xf32>
    %14 = arith.divf %12, %13 : vector<1x8xf32>
    %cst_10 = arith.constant dense<0xFF800000> : vector<1x8xf32>
    %15 = vector.multi_reduction <maximumf>, %11, %cst_10 [2] : vector<1x8x512xf32> to vector<1x8xf32>
    %c0_11 = arith.constant 0 : index
    %c0_12 = arith.constant 0 : index
    %16 = vector.load %arg3[%c0_11, %c0_12] : memref<8x4xf32, #tpu.memory_space<vmem>>, vector<8x4xf32>
    %c0_13 = arith.constant 0 : index
    %c0_14 = arith.constant 0 : index
    %17 = vector.load %arg4[%c0_13, %c0_14] : memref<1x4xf32, #tpu.memory_space<vmem>>, vector<1x4xf32>
    %c0_15 = arith.constant 0 : index
    %c0_16 = arith.constant 0 : index
    %18 = vector.load %arg5[%c0_15, %c0_16] : memref<4x8xf32, #tpu.memory_space<vmem>>, vector<4x8xf32>
    %c0_17 = arith.constant 0 : index
    %c0_18 = arith.constant 0 : index
    %19 = vector.load %arg6[%c0_17, %c0_18] : memref<1x8xf32, #tpu.memory_space<vmem>>, vector<1x8xf32>
    %20 = tpu.concatenate %14, %15 in 0 : vector<1x8xf32>, vector<1x8xf32> -> vector<2x8xf32>
    %cst_19 = arith.constant dense<0.000000e+00> : vector<2x4xf32>
    %21 = tpu.matmul %20, %16, %cst_19 {dimension_numbers = #tpu.dot_dimension_numbers<[1], [0], [0], [1], [0, 0, 1, 1], [], []>} : vector<2x8xf32>, vector<8x4xf32>, vector<2x4xf32> -> vector<2x4xf32>
    %22 = vector.broadcast %17 : vector<1x4xf32> to vector<2x4xf32>
    %23 = arith.addf %21, %22 : vector<2x4xf32>
    %cst_20 = arith.constant 0.000000e+00 : f32
    %24 = vector.broadcast %cst_20 : f32 to vector<2x4xf32>
    %25 = arith.maximumf %23, %24 : vector<2x4xf32>
    %cst_21 = arith.constant dense<0.000000e+00> : vector<2x8xf32>
    %26 = tpu.matmul %25, %18, %cst_21 {dimension_numbers = #tpu.dot_dimension_numbers<[1], [0], [0], [1], [0, 0, 1, 1], [], []>} : vector<2x4xf32>, vector<4x8xf32>, vector<2x8xf32> -> vector<2x8xf32>
    %27 = vector.broadcast %19 : vector<1x8xf32> to vector<2x8xf32>
    %28 = arith.addf %26, %27 : vector<2x8xf32>
    %c0_22 = arith.constant 0 : index
    %c0_23 = arith.constant 0 : index
    %c0_24 = arith.constant 0 : index
    %29 = vector.load %arg2[%c0_22, %c0_23, %c0_24] : memref<1x8x1xf32, #tpu.memory_space<vmem>>, vector<1x8x1xf32>
    %30 = vector.shape_cast %29 : vector<1x8x1xf32> to vector<1x8xf32>
    %31 = vector.extract_strided_slice %28 {offsets = [0, 0], sizes = [1, 8], strides = [1, 1]} : vector<2x8xf32> to vector<1x8xf32>
    %32 = vector.extract_strided_slice %28 {offsets = [1, 0], sizes = [1, 8], strides = [1, 1]} : vector<2x8xf32> to vector<1x8xf32>
    %33 = arith.addf %31, %32 : vector<1x8xf32>
    %34 = arith.addf %33, %30 : vector<1x8xf32>
    %35 = arith.negf %34 : vector<1x8xf32>
    %36 = math.exp %35 : vector<1x8xf32>
    %cst_25 = arith.constant 1.000000e+00 : f32
    %37 = vector.broadcast %cst_25 : f32 to vector<1x8xf32>
    %38 = arith.addf %37, %36 : vector<1x8xf32>
    %39 = arith.divf %37, %38 : vector<1x8xf32>
    %40 = vector.shape_cast %39 : vector<1x8xf32> to vector<1x8x1xf32>
    %41 = vector.broadcast %40 : vector<1x8x1xf32> to vector<1x8x512xf32>
    %42 = arith.mulf %11, %41 : vector<1x8x512xf32>
    %c0_26 = arith.constant 0 : index
    %c0_27 = arith.constant 0 : index
    %c0_28 = arith.constant 0 : index
    %43 = vector.load %arg7[%c0_26, %c0_27, %c0_28] : memref<1x8x512xf32, #tpu.memory_space<vmem>>, vector<1x8x512xf32>
    tpu.vector_store %arg7[%c0_26, %c0_27, %c0_28], %42 {strides = array<i32>} : memref<1x8x512xf32, #tpu.memory_space<vmem>>, vector<1x8x512xf32>,
    %44 = vector.shape_cast %39 : vector<1x8xf32> to vector<1x8x1xf32>
    %c0_29 = arith.constant 0 : index
    %c0_30 = arith.constant 0 : index
    %c0_31 = arith.constant 0 : index
    %45 = vector.load %arg8[%c0_29, %c0_30, %c0_31] : memref<1x8x1xf32, #tpu.memory_space<vmem>>, vector<1x8x1xf32>
    tpu.vector_store %arg8[%c0_29, %c0_30, %c0_31], %44 {strides = array<i32>} : memref<1x8x1xf32, #tpu.memory_space<vmem>>, vector<1x8x1xf32>,
    return
  }
  func.func @transform_0(%arg0: i32) -> (i32, i32, i32) {
    %c0_i32 = arith.constant 0 : i32
    %c0_i32_0 = arith.constant 0 : i32
    %c0_i32_1 = arith.constant 0 : i32
    return %arg0, %c0_i32, %c0_i32_0 : i32, i32, i32
  }
  func.func @transform_1(%arg0: i32) -> (i32, i32, i32) {
    %c0_i32 = arith.constant 0 : i32
    %c0_i32_0 = arith.constant 0 : i32
    %c0_i32_1 = arith.constant 0 : i32
    return %arg0, %c0_i32, %c0_i32_0 : i32, i32, i32
  }
  func.func @transform_2(%arg0: i32) -> (i32, i32) {
    %c0_i32 = arith.constant 0 : i32
    %c0_i32_0 = arith.constant 0 : i32
    %c0_i32_1 = arith.constant 0 : i32
    return %c0_i32, %c0_i32_0 : i32, i32
  }
  func.func @transform_3(%arg0: i32) -> (i32, i32) {
    %c0_i32 = arith.constant 0 : i32
    %c0_i32_0 = arith.constant 0 : i32
    %c0_i32_1 = arith.constant 0 : i32
    return %c0_i32, %c0_i32_0 : i32, i32
  }
  func.func @transform_4(%arg0: i32) -> (i32, i32) {
    %c0_i32 = arith.constant 0 : i32
    %c0_i32_0 = arith.constant 0 : i32
    %c0_i32_1 = arith.constant 0 : i32
    return %c0_i32, %c0_i32_0 : i32, i32
  }
  func.func @transform_5(%arg0: i32) -> (i32, i32) {
    %c0_i32 = arith.constant 0 : i32
    %c0_i32_0 = arith.constant 0 : i32
    %c0_i32_1 = arith.constant 0 : i32
    return %c0_i32, %c0_i32_0 : i32, i32
  }
  func.func @transform_6(%arg0: i32) -> (i32, i32, i32) {
    %c0_i32 = arith.constant 0 : i32
    %c0_i32_0 = arith.constant 0 : i32
    %c0_i32_1 = arith.constant 0 : i32
    return %arg0, %c0_i32, %c0_i32_0 : i32, i32, i32
  }
  func.func @transform_7(%arg0: i32) -> (i32, i32, i32) {
    %c0_i32 = arith.constant 0 : i32
    %c0_i32_0 = arith.constant 0 : i32
    %c0_i32_1 = arith.constant 0 : i32
    return %arg0, %c0_i32, %c0_i32_0 : i32, i32, i32
  }
}

</mosaic_0001>

<bundles_post_ra>
// kernel: attention_block.1
= control target key start
LH: loop header
LB: loop body
LE: loop exit
PB: predicated region body
PF: predicated region fallthrough
CT: control target
= control target key end

     0   :  { %s674_s24 = smov 0   ;;  %s738_s0 = inlined_call_operand.vmem [shape: f32[2,8,2048], index: 0, kind: input, shape index: {}]   ;;  %s739_s1 = inlined_call_operand.vmem [shape: f32[2,8,1], index: 1, kind: input, shape index: {}]   ;;  %s740_s2 = inlined_call_operand.vmem [shape: f32[8,4], index: 2, kind: input, shape index: {}]   ;;  %s741_s3 = inlined_call_operand.vmem [shape: f32[1,4], index: 3, kind: input, shape index: {}]   ;;  %s742_s4 = inlined_call_operand.vmem [shape: f32[4,8], index: 4, kind: input, shape index: {}]   ;;  %s743_s5 = inlined_call_operand.vmem [shape: f32[1,8], index: 5, kind: input, shape index: {}]   ;;  %s744_s6 = inlined_call_operand.vmem [shape: f32[2,8,512], index: 6, kind: output, shape index: {0}]   ;;  %s745_s7 = inlined_call_operand.vmem [shape: f32[2,8,1], index: 7, kind: output, shape index: {1}]  }
   0x1 LB: > { %s584_s25 = sadd.s32 4294967295, %s630_s24   ;;  %p588_p0 = scmp.ge.s32.totalorder %s630_s24, 1  ;;  %s630_s24 = sphi %s674_s24, %s18_s24  }
   0x2   : > { %p249_p1 = scmp.lt.s32.totalorder %s630_s24, 3 }
   0x4   : > { %p250_p2 = pnand %p588_p0, %p249_p1 }
   0x5   : > { %p289_p3 = scmp.lt.s32.totalorder (!%p250_p2), %s584_s25, 1 }
   0x6   : > { %253 = sbr.rel (%p250_p2) target bundleno = 572 (0x23c), region = 44 }
   0xb   : > { %s747_s25 = smov (!%p289_p3, %s584_s25), 1  ;;  %v632_v38 = vmov 512.0   ;;  %v365_v39 = vld [vmem:[%s740_s2] sm:$0xff]  ;;  %v370_v46 = vlaneseq  ;;  %vm377_vm1 = vcmask 1040384   ;;  %vm382_vm2 = vcmask 64512  }
   0xc   : > { %s601_s26 = sshll.u32 %s747_s25, 7  ;;  %618 = vrcp.f32 %v632_v38  ;;  %401 = vmatpush.msra.mxu0 %v365_v39  ;;  %s591_s9 = sshll.u32 %s747_s25, 3  ;;  %v367_v54 = vld [vmem:[%s742_s4] sm:$0xf]  ;;  %vm414_vm3 = vcmask 1043456   ;;  %v633_v56 = vmov 0  }
   0xd   : > { %s293_s29 = scalar_lea.vmem %s738_s0, %s601_s26  ;;  %v371_v48 = vand.u32 127, %v370_v46  ;;  %s297_s12 = scalar_lea.vmem %s739_s1, %s591_s9  ;;  %596 = vmatpush.msk.msra.mxu1 %vm414_vm3, %v367_v54  ;;  %613 = vset.pattern.permute.xlu1 %v633_v56  ;;  %v616_v57 = vld [vmem:[%s741_s3] ss:$0 sm:$0xff]  ;;  %vm410_vm4 = vcmask 31744   ;;  %v471_v61 = vshrl.u32 %v370_v46, 7  ;;  %vm484_vm9 = vcmask 7168  }
   0xe   : > { %v307_v0 = vld [vmem:[%s293_s29] sm:$0xff]  ;;  %v308_v1 = vld [vmem:[%s293_s29 + $0x8] sm:$0xff]  ;;  %v309_v2 = vld [vmem:[%s293_s29 + $0x10] sm:$0xff]  ;;  %s602_s19 = sshll.u32 %s747_s25, 5  ;;  %s306_s22 = scalar_lea.vmem %s745_s7, %s591_s9 }
   0xf   : > { %v310_v3 = vld [vmem:[%s293_s29 + $0x18] sm:$0xff]  ;;  %v311_v4 = vld [vmem:[%s293_s29 + $0x20] sm:$0xff]  ;;  %v312_v5 = vld [vmem:[%s293_s29 + $0x28] sm:$0xff]  ;;  %615 = vset.pattern.permute.xlu0 %v471_v61  ;;  %s302_s27 = scalar_lea.vmem %s744_s6, %s602_s19 }
  0x10   : > { %v313_v6 = vld [vmem:[%s293_s29 + $0x30] sm:$0xff]  ;;  %v314_v7 = vld [vmem:[%s293_s29 + $0x38] sm:$0xff]  ;;  %v315_v8 = vld [vmem:[%s293_s29 + $0x40] sm:$0xff]  ;;  %v323_v9 = vadd.f32 %v311_v4, %v307_v0  ;;  %v324_v10 = vadd.f32 %v312_v5, %v308_v1 }
  0x11   : > { %v316_v11 = vld [vmem:[%s293_s29 + $0x48] sm:$0xff]  ;;  %v317_v12 = vld [vmem:[%s293_s29 + $0x50] sm:$0xff]  ;;  %v318_v13 = vld [vmem:[%s293_s29 + $0x58] sm:$0xff]  ;;  %v325_v14 = vadd.f32 %v313_v6, %v309_v2  ;;  %v326_v15 = vadd.f32 %v314_v7, %v310_v3 }
  0x12   : > { %v319_v16 = vld [vmem:[%s293_s29 + $0x60] sm:$0xff]  ;;  %v320_v17 = vld [vmem:[%s293_s29 + $0x68] sm:$0xff]  ;;  %v321_v18 = vld [vmem:[%s293_s29 + $0x70] sm:$0xff]  ;;  %v327_v19 = vadd.f32 %v323_v9, %v315_v8  ;;  %v328_v20 = vadd.f32 %v324_v10, %v316_v11  ;;  %v619_v40 = vpop.eup %618 }
  0x13   : > { %v322_v21 = vld [vmem:[%s293_s29 + $0x78] sm:$0xff]  ;;  %v329_v22 = vadd.f32 %v325_v14, %v317_v12  ;;  %v330_v23 = vadd.f32 %v326_v15, %v318_v13  ;;  %v353_v41 = vmul.f32 512.0, %v619_v40  ;;  %vm357_vm0 = vweird.f32 %v619_v40  ;;  %v438_v55 = vld [vmem:[%s297_s12] sm:$0xff] }
  0x14   : > { %v331_v24 = vadd.f32 %v327_v19, %v319_v16  ;;  %v332_v25 = vadd.f32 %v328_v20, %v320_v17  ;;  %445 = vperm.xlu1 %613, %v438_v55   ;;  %v617_v62 = vld [vmem:[%s743_s5] ss:$0 sm:$0xff] }
  0x15   : > { %v333_v26 = vadd.f32 %v329_v22, %v321_v18  ;;  %v334_v27 = vadd.f32 %v330_v23, %v322_v21  ;;  %v354_v42 = vsub.f32 1.0, %v353_v41 }
  0x16   : > { %v688_v28 = vmul.f32 0.25, %v331_v24  ;;  %v690_v29 = vmul.f32 0.25, %v332_v25 }
  0x17   : > { %v692_v30 = vmul.f32 0.25, %v333_v26  ;;  %v694_v31 = vmul.f32 0.25, %v334_v27  ;;  %v355_v43 = vmul.f32 %v619_v40, %v354_v42 }
  0x18   : > { %v347_v32 = vadd.f32 %v690_v29, %v688_v28  ;;  %v360_v35 = vmax.f32 %v688_v28, %v690_v29 }
  0x19   : > { %v361_v36 = vmax.f32 %v692_v30, %v694_v31  ;;  %v356_v44 = vadd.f32 %v619_v40, %v355_v43 }
  0x1a   : > { %v348_v33 = vadd.f32 %v347_v32, %v692_v30 }
  0x1b   : > { %v362_v37 = vmax.f32 %v360_v35, %v361_v36  ;;  %v358_v47 = vsel %vm357_vm0, %v619_v40, %v356_v44 }
  0x1c   : > { %v349_v34 = vadd.f32 %v348_v33, %v694_v31  ;;  %614 = vset.pattern.permute.xlu1 %v471_v61 }
  0x1e   : > { %350 = vadd.xlane.f32.xlu0 %v349_v34 }
  0x26   : > { %363 = vmax.xlane.f32.xlu0 %v362_v37 }
  0x86   : > { %v446_v0 = vpop.permute.xlu1 %445 }
  0x87   : > { %v447_v3 = vperm.slane %v446_v0, %v371_v48 }
  0x91   : > { %v351_v45 = vpop.xlane.xlu0 %350 }
  0x92   : > { %v359_v49 = vmul.f32 %v358_v47, %v351_v45 }
  0x94   : > { %v372_v51 = vperm.slane %v359_v49, %v371_v48 }
  0x99   : > { %v364_v50 = vpop.xlane.xlu0 %363 }
  0x9a   : > { %v375_v52 = vperm.slane %v364_v50, %v371_v48 }
  0x9c   : > { %v378_v53 = vsel %vm377_vm1, %v372_v51, %v375_v52 }
  0x9d   : > { %595 = vmatmul.msk.f32.vlgmr.msra.gmra.mxu0 %vm382_vm2, %v378_v53 }
 0x11a   : > { %v403_v58 = vpop.f32.mrf.mxu0 }
 0x11b   : > { %v404_v59 = vadd.f32 %v616_v57, %v403_v58 }
 0x11d   : > { %v406_v60 = vmax.f32 %v404_v59, 0.0 }
 0x11f   : > { %597 = vmatmul.msk.f32.vlgmr.msra.gmra.mxu1 %vm410_vm4, %v406_v60 }
 0x19c   : > { %v435_v63 = vpop.f32.mrf.mxu1 }
 0x19d   : > { %v436_v1 = vadd.f32 %v617_v62, %v435_v63 }
 0x19f   : > { %v440_v2 = vrot.slane %v436_v1, 1 }
 0x1a1   : > { %v442_v4 = vadd.f32 %v440_v2, %v436_v1 }
 0x1a3   : > { %v449_v5 = vadd.f32 %v447_v3, %v442_v4 }
 0x1a5   : > { %v598_v6 = vmul.f32 -1.442695, %v449_v5 }
 0x1a7   : > { %620 = vpow2.f32 %v598_v6 }
 0x1ad   : > { %v621_v7 = vpop.eup %620 }
 0x1ae   : > { %v453_v8 = vadd.f32 1.0, %v621_v7 }
 0x1b0   : > { %622 = vrcp.f32 %v453_v8  ;;  %v465_v12 = vand.u32 2147483648, %v453_v8  ;;  %v463_v14 = vand.u32 2147483647, %v453_v8  ;;  %vm459_vm6 = vweird.f32 %v453_v8 }
 0x1b2   : > { %v466_v16 = vor.u32 1.1754944e-38, %v465_v12  ;;  %vm464_vm8 = vcmp.eq.f32.partialorder %v463_v14, 8.507059e+37 }
 0x1b6   : > { %v623_v9 = vpop.eup %622 }
 0x1b7   : > { %v455_v10 = vmul.f32 %v623_v9, %v453_v8  ;;  %vm460_vm5 = vweird.f32 %v623_v9 }
 0x1b8   : > { %vm461_vm7 = vmor %vm459_vm6, %vm460_vm5 }
 0x1b9   : > { %v456_v11 = vsub.f32 1.0, %v455_v10 }
 0x1bb   : > { %v457_v13 = vmul.f32 %v623_v9, %v456_v11 }
 0x1bd   : > { %v458_v15 = vadd.f32 %v623_v9, %v457_v13 }
 0x1bf   : > { %v462_v17 = vsel %vm461_vm7, %v623_v9, %v458_v15 }
 0x1c0   : > { %v467_v18 = vsel %vm464_vm8, %v466_v16, %v462_v17 }
 0x1c1   : > { %v469_v19 = vperm.slane %v467_v18, 0 }
 0x1c3   : > { %474 = vperm.xlu1 %614, %v469_v19  }
 0x235   : > { %v475_v20 = vpop.permute.xlu1 %474 }
 0x236   : > { %v476_v21 = vmul.f32 %v475_v20, %v688_v28  ;;  %v477_v22 = vmul.f32 %v475_v20, %v690_v29  ;;  %v478_v23 = vmul.f32 %v475_v20, %v692_v30  ;;  %485 = vst.msk [vmem:[%s306_s22] sm:$0xff] %vm484_vm9, %v475_v20  ;;  %v479_v24 = vmul.f32 %v475_v20, %v694_v31 }
 0x238   : > { %480 = vst [vmem:[%s302_s27] sm:$0xff] %v476_v21 }
 0x239   : > { %481 = vst [vmem:[%s302_s27 + $0x8] sm:$0xff] %v477_v22 }
 0x23a   : > { %482 = vst [vmem:[%s302_s27 + $0x10] sm:$0xff] %v478_v23 }
 0x23b   : > { %483 = vst [vmem:[%s302_s27 + $0x18] sm:$0xff] %v479_v24 }
 0x23c PF: > { %s18_s24 = sadd.s32 1, %s630_s24  }
 0x23d   : > { %p15_p4 = scmp.ge.s32.totalorder %s18_s24, 4  }
 0x23f   :  { %17 = sbr.rel (!%p15_p4) target bundleno = 1 (0x1), region = 89 }

</bundles_post_ra>
